<compile_context>
chip_gen: v6e
topology: v6e:2x2x1
jax: 0.10.0
libtpu: 0.0.40
codegen_flags: <defaults>
</compile_context>

<pallas_src>
import functools

import jax
import jax.numpy as jnp
import numpy as np
from jax.experimental import pallas as pl
from jax.experimental.pallas import tpu as pltpu

G_INPUT_SIZE = 10          # logical input features
LATENT_DIM = 15            # logical output features
H1 = 64
H2 = 128
BN_EPS = 1e-5
LRELU_SLOPE = 0.2

H1_P = 128                 # layer-1 hidden padded to a full lane group

# Rows per tile for the large-batch path.  With the 48 MiB scoped-VMEM limit
# below, 4096-row tiles double-buffer comfortably on v5e/v6e/v7x.
TILE_B_DEFAULT = 4096
VMEM_LIMIT_BYTES = 48 * 1024 * 1024


# --------------------------------------------------------------------------
# Kernels
# --------------------------------------------------------------------------
def _fused_kernel(x_ref,
                  w1_ref, b1_ref, g1_ref, be1_ref,
                  w2_ref, b2_ref, g2_ref, be2_ref,
                  w3_ref, b3_ref,
                  o_ref, *, n_valid):
    """Whole (small) batch resident in VMEM: one step does the full forward."""
    inv_n = 1.0 / float(n_valid)

    def bn_leaky(h, g, be):
        s = jnp.sum(h, axis=0, keepdims=True)
        q = jnp.sum(h * h, axis=0, keepdims=True)
        mu = s * inv_n
        var = jnp.maximum(q * inv_n - mu * mu, 0.0)        # biased variance
        h = (h - mu) * jax.lax.rsqrt(var + BN_EPS)
        h = h * g + be
        return jnp.where(h >= 0.0, h, LRELU_SLOPE * h)

    h = jnp.dot(x_ref[...], w1_ref[...],
                preferred_element_type=jnp.float32) + b1_ref[...]
    h = bn_leaky(h, g1_ref[...], be1_ref[...])
    h = jnp.dot(h, w2_ref[...],
                preferred_element_type=jnp.float32) + b2_ref[...]
    h = bn_leaky(h, g2_ref[...], be2_ref[...])
    h = jnp.dot(h, w3_ref[...],
                preferred_element_type=jnp.float32) + b3_ref[...]
    o_ref[...] = jnp.tanh(h)


def _stats_kernel(x_ref,
                  w1_ref, b1_ref, g1_ref, be1_ref,
                  w2_ref, b2_ref,
                  mu1_ref, is1_ref, mu2_ref, is2_ref,
                  *, n_valid, tile_b, masked):
    """Grid (2, n_tiles): phase 0 accumulates layer-1 pre-BN sum / sum-of-
    squares across all row tiles, phase 1 does the same for layer 2 using the
    finalized layer-1 statistics.  Sums are accumulated directly in the tiny
    (1,128) output refs (block index is constant, so they stay VMEM-resident
    and are flushed to HBM exactly once at grid end) and converted in place to
    (mean, inv_std).  Padded batch rows are masked out of the statistics on
    the final tile only."""
    p = pl.program_id(0)
    t = pl.program_id(1)
    nt = pl.num_programs(1)
    inv_n = 1.0 / float(n_valid)

    def accumulate(h, s_ref, q_ref):
        def unmasked():
            s_ref[...] += jnp.sum(h, axis=0, keepdims=True)
            q_ref[...] += jnp.sum(h * h, axis=0, keepdims=True)

        if not masked:
            unmasked()
        else:
            pl.when(t < nt - 1)(unmasked)

            @pl.when(t == nt - 1)
            def _():
                rows = jax.lax.broadcasted_iota(jnp.int32, (tile_b, 1), 0)
                valid_in_tile = n_valid - t * tile_b
                m = (rows < valid_in_tile).astype(jnp.float32)
                hm = h * m
                s_ref[...] += jnp.sum(hm, axis=0, keepdims=True)
                q_ref[...] += jnp.sum(hm * h, axis=0, keepdims=True)

    def finalize(s_ref, q_ref):
        mu = s_ref[...] * inv_n
        var = jnp.maximum(q_ref[...] * inv_n - mu * mu, 0.0)
        s_ref[...] = mu                              # now holds the mean
        q_ref[...] = jax.lax.rsqrt(var + BN_EPS)     # now holds inv_std

    def layer1_raw():
        return jnp.dot(x_ref[...], w1_ref[...],
                       preferred_element_type=jnp.float32) + b1_ref[...]

    @pl.when(p == 0)
    def _phase0():
        @pl.when(t == 0)
        def _():
            mu1_ref[...] = jnp.zeros_like(mu1_ref)
            is1_ref[...] = jnp.zeros_like(is1_ref)

        accumulate(layer1_raw(), mu1_ref, is1_ref)

        @pl.when(t == nt - 1)
        def _():
            finalize(mu1_ref, is1_ref)

    @pl.when(p == 1)
    def _phase1():
        @pl.when(t == 0)
        def _():
            mu2_ref[...] = jnp.zeros_like(mu2_ref)
            is2_ref[...] = jnp.zeros_like(is2_ref)

        h = (layer1_raw() - mu1_ref[...]) * is1_ref[...]
        h = h * g1_ref[...] + be1_ref[...]
        h = jnp.where(h >= 0.0, h, LRELU_SLOPE * h)
        h = jnp.dot(h, w2_ref[...],
                    preferred_element_type=jnp.float32) + b2_ref[...]
        accumulate(h, mu2_ref, is2_ref)

        @pl.when(t == nt - 1)
        def _():
            finalize(mu2_ref, is2_ref)


def _apply_kernel(x_ref,
                  w1_ref, b1_ref, g1_ref, be1_ref,
                  w2_ref, b2_ref, g2_ref, be2_ref,
                  w3_ref, b3_ref,
                  mu1_ref, is1_ref, mu2_ref, is2_ref,
                  o_ref):
    """Grid (n_tiles,), 'parallel': full forward of one row tile using the
    finalized BatchNorm statistics; each output tile is written exactly once."""
    h = jnp.dot(x_ref[...], w1_ref[...],
                preferred_element_type=jnp.float32) + b1_ref[...]
    h = (h - mu1_ref[...]) * is1_ref[...] * g1_ref[...] + be1_ref[...]
    h = jnp.where(h >= 0.0, h, LRELU_SLOPE * h)
    h = jnp.dot(h, w2_ref[...],
                preferred_element_type=jnp.float32) + b2_ref[...]
    h = (h - mu2_ref[...]) * is2_ref[...] * g2_ref[...] + be2_ref[...]
    h = jnp.where(h >= 0.0, h, LRELU_SLOPE * h)
    h = jnp.dot(h, w3_ref[...],
                preferred_element_type=jnp.float32) + b3_ref[...]
    o_ref[...] = jnp.tanh(h)


# --------------------------------------------------------------------------
# Wrapper / plumbing
# --------------------------------------------------------------------------
def _full_spec0(a):
    """Whole-array block for a grid-less call."""
    nd = a.ndim
    return pl.BlockSpec(a.shape, lambda: (0,) * nd)


def _full_spec1(a):
    """Whole-array, grid-invariant block for a 1-D grid."""
    nd = a.ndim
    return pl.BlockSpec(a.shape, lambda t: (0,) * nd)


def _full_spec2(a):
    """Whole-array, grid-invariant block for a 2-D grid."""
    nd = a.ndim
    return pl.BlockSpec(a.shape, lambda p, t: (0,) * nd)


def _pad2d(a, shape):
    out = jnp.zeros(shape, jnp.float32)
    return out.at[: a.shape[0], : a.shape[1]].set(a.astype(jnp.float32))


def pad_params(p):
    """Pad hidden-layer-1 (64) to a full 128-lane group.  The input (10) and
    output (15) feature dims are NOT padded — Mosaic handles them internally
    and keeping them narrow minimizes HBM traffic.  gamma/beta are padded with
    0 so padded columns stay exactly 0 through BN + LeakyReLU."""
    return {
        "w1": _pad2d(p["w1"], (G_INPUT_SIZE, H1_P)),   # (10, 128)
        "b1": _pad2d(p["b1"], (1, H1_P)),
        "g1": _pad2d(p["g1"], (1, H1_P)),
        "be1": _pad2d(p["be1"], (1, H1_P)),
        "w2": _pad2d(p["w2"], (H1_P, H2)),             # (128, 128)
        "b2": _pad2d(p["b2"], (1, H2)),
        "g2": _pad2d(p["g2"], (1, H2)),
        "be2": _pad2d(p["be2"], (1, H2)),
        "w3": _pad2d(p["w3"], (H2, LATENT_DIM)),       # (128, 15)
        "b3": _pad2d(p["b3"], (1, LATENT_DIM)),        # (1, 15)
    }


@functools.partial(jax.jit, static_argnames=("tile_b_max",))
def generator_forward(x, padded_params, tile_b_max=TILE_B_DEFAULT):
    """x: [B, 10] float32 -> [B, 15] float32 (BatchNorm in training mode)."""
    B = x.shape[0]
    pp = padded_params
    x = x.astype(jnp.float32)

    # ---------------- small batch: single fused VMEM-resident kernel --------
    if B <= tile_b_max:
        operands = (x,
                    pp["w1"], pp["b1"], pp["g1"], pp["be1"],
                    pp["w2"], pp["b2"], pp["g2"], pp["be2"],
                    pp["w3"], pp["b3"])
        return pl.pallas_call(
            functools.partial(_fused_kernel, n_valid=B),
            out_shape=jax.ShapeDtypeStruct((B, LATENT_DIM), jnp.float32),
            in_specs=[_full_spec0(a) for a in operands],
            out_specs=pl.BlockSpec((B, LATENT_DIM), lambda: (0, 0)),
            compiler_params=pltpu.CompilerParams(
                vmem_limit_bytes=VMEM_LIMIT_BYTES),
        )(*operands)

    # ---------------- large batch: stats pass + parallel apply pass ---------
    tile_b = tile_b_max
    n_tiles = -(-B // tile_b)
    b_pad = tile_b * n_tiles
    masked = b_pad != B
    xp = jnp.pad(x, ((0, b_pad - B), (0, 0))) if masked else x

    # Pass 1: exact per-batch BatchNorm statistics (sequential accumulation).
    stats_operands = (xp, pp["w1"], pp["b1"], pp["g1"], pp["be1"],
                      pp["w2"], pp["b2"])
    x_spec2 = pl.BlockSpec((tile_b, G_INPUT_SIZE), lambda p, t: (t, 0))
    stat_spec = pl.BlockSpec((1, H1_P), lambda p, t: (0, 0))
    mu1, is1, mu2, is2 = pl.pallas_call(
        functools.partial(_stats_kernel, n_valid=B, tile_b=tile_b,
                          masked=masked),
        out_shape=(jax.ShapeDtypeStruct((1, H1_P), jnp.float32),) * 4,
        grid_spec=pltpu.PrefetchScalarGridSpec(
            num_scalar_prefetch=0,
            grid=(2, n_tiles),
            in_specs=[x_spec2] + [_full_spec2(a) for a in stats_operands[1:]],
            out_specs=[stat_spec] * 4),
        compiler_params=pltpu.CompilerParams(
            dimension_semantics=("arbitrary", "arbitrary"),
            vmem_limit_bytes=VMEM_LIMIT_BYTES),
    )(*stats_operands)

    # Pass 2: apply (parallel over row tiles -> both TensorCores on v7x).
    apply_operands = (xp,
                      pp["w1"], pp["b1"], pp["g1"], pp["be1"],
                      pp["w2"], pp["b2"], pp["g2"], pp["be2"],
                      pp["w3"], pp["b3"],
                      mu1, is1, mu2, is2)
    x_spec1 = pl.BlockSpec((tile_b, G_INPUT_SIZE), lambda t: (t, 0))
    out = pl.pallas_call(
        _apply_kernel,
        out_shape=jax.ShapeDtypeStruct((b_pad, LATENT_DIM), jnp.float32),
        grid_spec=pltpu.PrefetchScalarGridSpec(
            num_scalar_prefetch=0,
            grid=(n_tiles,),
            in_specs=[x_spec1] + [_full_spec1(a) for a in apply_operands[1:]],
            out_specs=pl.BlockSpec((tile_b, LATENT_DIM), lambda t: (t, 0))),
        compiler_params=pltpu.CompilerParams(
            dimension_semantics=("parallel",),
            vmem_limit_bytes=VMEM_LIMIT_BYTES),
    )(*apply_operands)

    return out[:B] if masked else out


# --------------------------------------------------------------------------
# Parameter init (PyTorch-default-like) and pure-JAX reference
# --------------------------------------------------------------------------
def init_params(key):
    """Deterministic init mimicking PyTorch's default U(-1/sqrt(fan_in), +...)."""
    def linear(k, fan_in, fan_out):
        kw, kb = jax.random.split(k)
        bound = 1.0 / np.sqrt(fan_in)
        w = jax.random.uniform(kw, (fan_in, fan_out), jnp.float32, -bound, bound)
        b = jax.random.uniform(kb, (1, fan_out), jnp.float32, -bound, bound)
        return w, b

    k1, k2, k3 = jax.random.split(key, 3)
    w1, b1 = linear(k1, G_INPUT_SIZE, H1)
    w2, b2 = linear(k2, H1, H2)
    w3, b3 = linear(k3, H2, LATENT_DIM)
    return {
        "w1": w1, "b1": b1,
        "g1": jnp.ones((1, H1), jnp.float32), "be1": jnp.zeros((1, H1), jnp.float32),
        "w2": w2, "b2": b2,
        "g2": jnp.ones((1, H2), jnp.float32), "be2": jnp.zeros((1, H2), jnp.float32),
        "w3": w3, "b3": b3,
    }


def _reference(x, p):
    """Pure-JAX reference (unpadded) for validation."""
    h = x @ p["w1"] + p["b1"]
    mu = h.mean(0, keepdims=True); var = ((h - mu) ** 2).mean(0, keepdims=True)
    h = (h - mu) / jnp.sqrt(var + BN_EPS) * p["g1"] + p["be1"]
    h = jnp.where(h >= 0, h, LRELU_SLOPE * h)
    h = h @ p["w2"] + p["b2"]
    mu = h.mean(0, keepdims=True); var = ((h - mu) ** 2).mean(0, keepdims=True)
    h = (h - mu) / jnp.sqrt(var + BN_EPS) * p["g2"] + p["be2"]
    h = jnp.where(h >= 0, h, LRELU_SLOPE * h)
    return jnp.tanh(h @ p["w3"] + p["b3"])


if __name__ == "__main__":
    key = jax.random.PRNGKey(0)
    kx1, kx2, kx3, kp = jax.random.split(key, 4)

    params = init_params(kp)
    pp = pad_params(params)

    # 1) Small batch -> single fused VMEM-resident kernel (BatchNorm needs B > 1).
    B1 = 8
    x1 = jax.random.normal(kx1, (B1, G_INPUT_SIZE), jnp.float32)
    out1 = jax.block_until_ready(generator_forward(x1, pp))
    ref1 = _reference(x1, params)
    assert out1.shape == (B1, LATENT_DIM)
    np.testing.assert_allclose(np.asarray(out1), np.asarray(ref1),
                               rtol=1e-5, atol=2e-5)

    # 2) Tiled (stats + parallel apply) path with masked batch padding:
    #    40 rows, tile 16 -> 3 tiles, last tile padded.
    B2 = 40
    x2 = jax.random.normal(kx2, (B2, G_INPUT_SIZE), jnp.float32)
    out2 = jax.block_until_ready(generator_forward(x2, pp, tile_b_max=16))
    ref2 = _reference(x2, params)
    assert out2.shape == (B2, LATENT_DIM)
    np.testing.assert_allclose(np.asarray(out2), np.asarray(ref2),
                               rtol=1e-5, atol=2e-5)

    # 3) Tiled path, exact tile multiple (no masking, no output slice).
    B3 = 32
    x3 = jax.random.normal(kx3, (B3, G_INPUT_SIZE), jnp.float32)
    out3 = jax.block_until_ready(generator_forward(x3, pp, tile_b_max=16))
    ref3 = _reference(x3, params)
    assert out3.shape == (B3, LATENT_DIM)
    np.testing.assert_allclose(np.asarray(out3), np.asarray(ref3),
                               rtol=1e-5, atol=2e-5)

    print("KERNEL_OK")
</pallas_src>

<mosaic_0001>
module attributes {stable_mosaic.version = 11 : i64} {
  func.func @_fused_kernel(%arg0: memref<8x10xf32, #tpu.memory_space<vmem>>, %arg1: memref<10x128xf32, #tpu.memory_space<vmem>>, %arg2: memref<1x128xf32, #tpu.memory_space<vmem>>, %arg3: memref<1x128xf32, #tpu.memory_space<vmem>>, %arg4: memref<1x128xf32, #tpu.memory_space<vmem>>, %arg5: memref<128x128xf32, #tpu.memory_space<vmem>>, %arg6: memref<1x128xf32, #tpu.memory_space<vmem>>, %arg7: memref<1x128xf32, #tpu.memory_space<vmem>>, %arg8: memref<1x128xf32, #tpu.memory_space<vmem>>, %arg9: memref<128x15xf32, #tpu.memory_space<vmem>>, %arg10: memref<1x15xf32, #tpu.memory_space<vmem>>, %arg11: memref<8x15xf32, #tpu.memory_space<vmem>>) attributes {dimension_semantics = [], scalar_prefetch = 0 : i64, scratch_operands = 0 : i64, tpu.core_type = #tpu.core_type<tc>} {
    %c0 = arith.constant 0 : index
    %c0_0 = arith.constant 0 : index
    %0 = vector.load %arg0[%c0, %c0_0] : memref<8x10xf32, #tpu.memory_space<vmem>>, vector<8x10xf32>
    %c0_1 = arith.constant 0 : index
    %c0_2 = arith.constant 0 : index
    %1 = vector.load %arg1[%c0_1, %c0_2] : memref<10x128xf32, #tpu.memory_space<vmem>>, vector<10x128xf32>
    %cst = arith.constant dense<0.000000e+00> : vector<8x128xf32>
    %2 = tpu.matmul %0, %1, %cst {dimension_numbers = #tpu.dot_dimension_numbers<[1], [0], [0], [1], [0, 0, 1, 1], [], []>} : vector<8x10xf32>, vector<10x128xf32>, vector<8x128xf32> -> vector<8x128xf32>
    %c0_3 = arith.constant 0 : index
    %c0_4 = arith.constant 0 : index
    %3 = vector.load %arg2[%c0_3, %c0_4] : memref<1x128xf32, #tpu.memory_space<vmem>>, vector<1x128xf32>
    %4 = vector.broadcast %3 : vector<1x128xf32> to vector<8x128xf32>
    %5 = arith.addf %2, %4 : vector<8x128xf32>
    %c0_5 = arith.constant 0 : index
    %c0_6 = arith.constant 0 : index
    %6 = vector.load %arg3[%c0_5, %c0_6] : memref<1x128xf32, #tpu.memory_space<vmem>>, vector<1x128xf32>
    %c0_7 = arith.constant 0 : index
    %c0_8 = arith.constant 0 : index
    %7 = vector.load %arg4[%c0_7, %c0_8] : memref<1x128xf32, #tpu.memory_space<vmem>>, vector<1x128xf32>
    %cst_9 = arith.constant dense<0.000000e+00> : vector<128xf32>
    %8 = vector.multi_reduction <add>, %5, %cst_9 [0] : vector<8x128xf32> to vector<128xf32>
    %9 = vector.shape_cast %8 : vector<128xf32> to vector<1x128xf32>
    %10 = arith.mulf %5, %5 : vector<8x128xf32>
    %cst_10 = arith.constant dense<0.000000e+00> : vector<128xf32>
    %11 = vector.multi_reduction <add>, %10, %cst_10 [0] : vector<8x128xf32> to vector<128xf32>
    %12 = vector.shape_cast %11 : vector<128xf32> to vector<1x128xf32>
    %cst_11 = arith.constant 1.250000e-01 : f32
    %13 = vector.broadcast %cst_11 : f32 to vector<1x128xf32>
    %14 = arith.mulf %9, %13 : vector<1x128xf32>
    %cst_12 = arith.constant 1.250000e-01 : f32
    %15 = vector.broadcast %cst_12 : f32 to vector<1x128xf32>
    %16 = arith.mulf %12, %15 : vector<1x128xf32>
    %17 = arith.mulf %14, %14 : vector<1x128xf32>
    %18 = arith.subf %16, %17 : vector<1x128xf32>
    %cst_13 = arith.constant 0.000000e+00 : f32
    %19 = vector.broadcast %cst_13 : f32 to vector<1x128xf32>
    %20 = arith.maximumf %18, %19 : vector<1x128xf32>
    %21 = vector.broadcast %14 : vector<1x128xf32> to vector<8x128xf32>
    %22 = arith.subf %5, %21 : vector<8x128xf32>
    %cst_14 = arith.constant 9.99999974E-6 : f32
    %23 = vector.broadcast %cst_14 : f32 to vector<1x128xf32>
    %24 = arith.addf %20, %23 : vector<1x128xf32>
    %25 = math.rsqrt %24 : vector<1x128xf32>
    %26 = vector.broadcast %25 : vector<1x128xf32> to vector<8x128xf32>
    %27 = arith.mulf %22, %26 : vector<8x128xf32>
    %28 = vector.broadcast %6 : vector<1x128xf32> to vector<8x128xf32>
    %29 = arith.mulf %27, %28 : vector<8x128xf32>
    %30 = vector.broadcast %7 : vector<1x128xf32> to vector<8x128xf32>
    %31 = arith.addf %29, %30 : vector<8x128xf32>
    %cst_15 = arith.constant 0.000000e+00 : f32
    %32 = vector.broadcast %cst_15 : f32 to vector<8x128xf32>
    %33 = arith.cmpf oge, %31, %32 : vector<8x128xf32>
    %cst_16 = arith.constant 2.000000e-01 : f32
    %34 = vector.broadcast %cst_16 : f32 to vector<8x128xf32>
    %35 = arith.mulf %34, %31 : vector<8x128xf32>
    %36 = arith.select %33, %31, %35 : vector<8x128xi1>, vector<8x128xf32>
    %c0_17 = arith.constant 0 : index
    %c0_18 = arith.constant 0 : index
    %37 = vector.load %arg5[%c0_17, %c0_18] : memref<128x128xf32, #tpu.memory_space<vmem>>, vector<128x128xf32>
    %cst_19 = arith.constant dense<0.000000e+00> : vector<8x128xf32>
    %38 = tpu.matmul %36, %37, %cst_19 {dimension_numbers = #tpu.dot_dimension_numbers<[1], [0], [0], [1], [0, 0, 1, 1], [], []>} : vector<8x128xf32>, vector<128x128xf32>, vector<8x128xf32> -> vector<8x128xf32>
    %c0_20 = arith.constant 0 : index
    %c0_21 = arith.constant 0 : index
    %39 = vector.load %arg6[%c0_20, %c0_21] : memref<1x128xf32, #tpu.memory_space<vmem>>, vector<1x128xf32>
    %40 = vector.broadcast %39 : vector<1x128xf32> to vector<8x128xf32>
    %41 = arith.addf %38, %40 : vector<8x128xf32>
    %c0_22 = arith.constant 0 : index
    %c0_23 = arith.constant 0 : index
    %42 = vector.load %arg7[%c0_22, %c0_23] : memref<1x128xf32, #tpu.memory_space<vmem>>, vector<1x128xf32>
    %c0_24 = arith.constant 0 : index
    %c0_25 = arith.constant 0 : index
    %43 = vector.load %arg8[%c0_24, %c0_25] : memref<1x128xf32, #tpu.memory_space<vmem>>, vector<1x128xf32>
    %cst_26 = arith.constant dense<0.000000e+00> : vector<128xf32>
    %44 = vector.multi_reduction <add>, %41, %cst_26 [0] : vector<8x128xf32> to vector<128xf32>
    %45 = vector.shape_cast %44 : vector<128xf32> to vector<1x128xf32>
    %46 = arith.mulf %41, %41 : vector<8x128xf32>
    %cst_27 = arith.constant dense<0.000000e+00> : vector<128xf32>
    %47 = vector.multi_reduction <add>, %46, %cst_27 [0] : vector<8x128xf32> to vector<128xf32>
    %48 = vector.shape_cast %47 : vector<128xf32> to vector<1x128xf32>
    %cst_28 = arith.constant 1.250000e-01 : f32
    %49 = vector.broadcast %cst_28 : f32 to vector<1x128xf32>
    %50 = arith.mulf %45, %49 : vector<1x128xf32>
    %cst_29 = arith.constant 1.250000e-01 : f32
    %51 = vector.broadcast %cst_29 : f32 to vector<1x128xf32>
    %52 = arith.mulf %48, %51 : vector<1x128xf32>
    %53 = arith.mulf %50, %50 : vector<1x128xf32>
    %54 = arith.subf %52, %53 : vector<1x128xf32>
    %cst_30 = arith.constant 0.000000e+00 : f32
    %55 = vector.broadcast %cst_30 : f32 to vector<1x128xf32>
    %56 = arith.maximumf %54, %55 : vector<1x128xf32>
    %57 = vector.broadcast %50 : vector<1x128xf32> to vector<8x128xf32>
    %58 = arith.subf %41, %57 : vector<8x128xf32>
    %cst_31 = arith.constant 9.99999974E-6 : f32
    %59 = vector.broadcast %cst_31 : f32 to vector<1x128xf32>
    %60 = arith.addf %56, %59 : vector<1x128xf32>
    %61 = math.rsqrt %60 : vector<1x128xf32>
    %62 = vector.broadcast %61 : vector<1x128xf32> to vector<8x128xf32>
    %63 = arith.mulf %58, %62 : vector<8x128xf32>
    %64 = vector.broadcast %42 : vector<1x128xf32> to vector<8x128xf32>
    %65 = arith.mulf %63, %64 : vector<8x128xf32>
    %66 = vector.broadcast %43 : vector<1x128xf32> to vector<8x128xf32>
    %67 = arith.addf %65, %66 : vector<8x128xf32>
    %cst_32 = arith.constant 0.000000e+00 : f32
    %68 = vector.broadcast %cst_32 : f32 to vector<8x128xf32>
    %69 = arith.cmpf oge, %67, %68 : vector<8x128xf32>
    %cst_33 = arith.constant 2.000000e-01 : f32
    %70 = vector.broadcast %cst_33 : f32 to vector<8x128xf32>
    %71 = arith.mulf %70, %67 : vector<8x128xf32>
    %72 = arith.select %69, %67, %71 : vector<8x128xi1>, vector<8x128xf32>
    %c0_34 = arith.constant 0 : index
    %c0_35 = arith.constant 0 : index
    %73 = vector.load %arg9[%c0_34, %c0_35] : memref<128x15xf32, #tpu.memory_space<vmem>>, vector<128x15xf32>
    %cst_36 = arith.constant dense<0.000000e+00> : vector<8x15xf32>
    %74 = tpu.matmul %72, %73, %cst_36 {dimension_numbers = #tpu.dot_dimension_numbers<[1], [0], [0], [1], [0, 0, 1, 1], [], []>} : vector<8x128xf32>, vector<128x15xf32>, vector<8x15xf32> -> vector<8x15xf32>
    %c0_37 = arith.constant 0 : index
    %c0_38 = arith.constant 0 : index
    %75 = vector.load %arg10[%c0_37, %c0_38] : memref<1x15xf32, #tpu.memory_space<vmem>>, vector<1x15xf32>
    %76 = vector.broadcast %75 : vector<1x15xf32> to vector<8x15xf32>
    %77 = arith.addf %74, %76 : vector<8x15xf32>
    %78 = math.tanh %77 : vector<8x15xf32>
    %c0_39 = arith.constant 0 : index
    %c0_40 = arith.constant 0 : index
    %79 = vector.load %arg11[%c0_39, %c0_40] : memref<8x15xf32, #tpu.memory_space<vmem>>, vector<8x15xf32>
    tpu.vector_store %arg11[%c0_39, %c0_40], %78 {strides = array<i32>} : memref<8x15xf32, #tpu.memory_space<vmem>>, vector<8x15xf32>,
    return
  }
}

</mosaic_0001>

<bundles_post_ra>
// kernel: generator_forward.1
= control target key start
LH: loop header
LB: loop body
LE: loop exit
PB: predicated region body
PF: predicated region fallthrough
CT: control target
= control target key end

     0   :  { %16 = vsyncpa [#allocation3], 0  ;;  %s1009_s0 = inlined_call_operand.hbm [shape: f32[8,10], index: 0, kind: input, shape index: {}]   ;;  %s1010_s1 = inlined_call_operand.vmem [shape: f32[10,128], index: 1, kind: input, shape index: {}]   ;;  %s1011_s2 = inlined_call_operand.vmem [shape: f32[1,128], index: 2, kind: input, shape index: {}]   ;;  %s1012_s3 = inlined_call_operand.vmem [shape: f32[1,128], index: 3, kind: input, shape index: {}]   ;;  %s1013_s4 = inlined_call_operand.hbm [shape: f32[1,128], index: 4, kind: input, shape index: {}]   ;;  %s1014_s5 = inlined_call_operand.vmem [shape: f32[128,128], index: 5, kind: input, shape index: {}]   ;;  %s1015_s6 = inlined_call_operand.hbm [shape: f32[1,128], index: 6, kind: input, shape index: {}]   ;;  %s1016_s7 = inlined_call_operand.hbm [shape: f32[1,128], index: 7, kind: input, shape index: {}]   ;;  %s1017_s8 = inlined_call_operand.hbm [shape: f32[1,128], index: 8, kind: input, shape index: {}]   ;;  %s1018_s9 = inlined_call_operand.vmem [shape: f32[128,15], index: 9, kind: input, shape index: {}]   ;;  %s1019_s10 = inlined_call_operand.hbm [shape: f32[1,15], index: 10, kind: input, shape index: {}]   ;;  %s1020_s11 = inlined_call_operand.hbm [shape: f32[8,15], index: 11, kind: output, shape index: {}]  }
   0x1   :  { %17 = vsyncpa [#allocation6], 0 }
   0x2   :  { %18 = vsyncpa [#allocation9], 0 }
   0x3   :  { %19 = vsyncpa [#allocation12], 0 }
   0x4   :  { %20 = vsyncpa [#allocation4], 0  ;;  %s774_s17 = smov [#allocation5]   ;;  %s775_s19 = smov [#allocation8]  }
   0x5   :  { %s43_s18 = sshll.u32 %s774_s17, 4  ;;  %s65_s20 = sshll.u32 %s775_s19, 4  ;;  %s44_s18 = int_to_ptr.vmem [resolvable:$true] %s43_s18  ;;  %s66_s20 = int_to_ptr.vmem [resolvable:$true] %s65_s20 }
   0x6   :  { %s632_s21 = scalar_lea.vmem %s44_s18, 16  ;;  %s636_s22 = scalar_lea.vmem %s44_s18, 32 }
   0x7   :  { %p633_p0 = scmp.ne.s32.totalorder %s44_s18, %s632_s21  ;;  %p637_p1 = scmp.lt.s32.totalorder %s44_s18, %s44_s18 }
   0x8   :  { %p638_p2 = scmp.lt.s32.totalorder %s636_s22, %s632_s21 }
   0xa   :  { %p639_p3 = por %p638_p2, %p637_p1 }
   0xc   :  { %p640_p4 = pnand %p639_p3, %p633_p0 }
   0xe   :  { %643 = shalt.err (!%p640_p4)
}
   0xf   :  { %46 = dma.hbm_to_vmem [thread:$0]  %s1013_s4, 16, %s44_s18, [#allocation6]  }
  0x10   :  { %s652_s25 = scalar_lea.vmem %s66_s20, 16  ;;  %s656_s26 = scalar_lea.vmem %s66_s20, 32 }
  0x11   :  { %p653_p5 = scmp.ne.s32.totalorder %s66_s20, %s652_s25  ;;  %p657_p6 = scmp.lt.s32.totalorder %s66_s20, %s66_s20 }
  0x12   :  { %p658_p7 = scmp.lt.s32.totalorder %s656_s26, %s652_s25 }
  0x14   :  { %p659_p8 = por %p658_p7, %p657_p6 }
  0x16   :  { %p660_p9 = pnand %p659_p8, %p653_p5 }
  0x18   :  { %663 = shalt.err (!%p660_p9)
}
  0x19   :  { %68 = dma.hbm_to_vmem [thread:$0]  %s1016_s7, 16, %s66_s20, [#allocation9]  }
  0x1a   :  { %s776_s29 = smov [#allocation2]   ;;  %s777_s12 = smov [#allocation7]  }
  0x1b   :  { %s27_s30 = sshll.u32 %s776_s29, 4  ;;  %s55_s13 = sshll.u32 %s777_s12, 4  ;;  %s28_s30 = int_to_ptr.vmem [resolvable:$true] %s27_s30  ;;  %s56_s13 = int_to_ptr.vmem [resolvable:$true] %s55_s13 }
  0x1c   :  { %s672_s14 = scalar_lea.vmem %s28_s30, 128  ;;  %p677_p11 = scmp.lt.s32.totalorder %s28_s30, %s28_s30 }
  0x1d   :  { %p673_p10 = scmp.ne.s32.totalorder %s28_s30, %s672_s14  ;;  %p678_p12 = scmp.lt.s32.totalorder %s672_s14, %s672_s14 }
  0x1f   :  { %p679_p13 = por %p678_p12, %p677_p11 }
  0x21   :  { %p680_p0 = pnand %p679_p13, %p673_p10 }
  0x23   :  { %683 = shalt.err (!%p680_p0)
}
  0x24   :  { %30 = dma.hbm_to_vmem [thread:$0]  %s1009_s0, 128, %s28_s30, [#allocation3]  }
  0x25   :  { %s692_s16 = scalar_lea.vmem %s56_s13, 16  ;;  %s696_s7 = scalar_lea.vmem %s56_s13, 32 }
  0x26   :  { %p693_p1 = scmp.ne.s32.totalorder %s56_s13, %s692_s16  ;;  %p697_p2 = scmp.lt.s32.totalorder %s56_s13, %s56_s13 }
  0x27   :  { %p698_p3 = scmp.lt.s32.totalorder %s696_s7, %s692_s16 }
  0x29   :  { %p699_p4 = por %p698_p3, %p697_p2 }
  0x2b   :  { %p700_p5 = pnand %p699_p4, %p693_p1 }
  0x2d   :  { %703 = shalt.err (!%p700_p5)
}
  0x2e   :  { %58 = dma.hbm_to_vmem [thread:$0]  %s1015_s6, 16, %s56_s13, [#allocation6]  }
  0x2f   :  { %s778_s19 = smov [#allocation10]   ;;  %s779_s21 = smov [#allocation11]  }
  0x30   :  { %s75_s20 = sshll.u32 %s778_s19, 4  ;;  %s87_s22 = sshll.u32 %s779_s21, 4  ;;  %s76_s20 = int_to_ptr.vmem [resolvable:$true] %s75_s20  ;;  %s88_s22 = int_to_ptr.vmem [resolvable:$true] %s87_s22 }
  0x31   :  { %s712_s23 = scalar_lea.vmem %s76_s20, 16  ;;  %s716_s0 = scalar_lea.vmem %s76_s20, 32 }
  0x32   :  { %p713_p6 = scmp.ne.s32.totalorder %s76_s20, %s712_s23  ;;  %p717_p7 = scmp.lt.s32.totalorder %s76_s20, %s76_s20 }
  0x33   :  { %p718_p8 = scmp.lt.s32.totalorder %s716_s0, %s712_s23 }
  0x35   :  { %p719_p9 = por %p718_p8, %p717_p7 }
  0x37   :  { %p720_p10 = pnand %p719_p9, %p713_p6 }
  0x39   :  { %723 = shalt.err (!%p720_p10)
}
  0x3a   :  { %78 = dma.hbm_to_vmem [thread:$0]  %s1017_s8, 16, %s76_s20, [#allocation9]  }
  0x3b   :  { %s732_s26 = scalar_lea.vmem %s88_s22, 16  ;;  %s736_s6 = scalar_lea.vmem %s88_s22, 32 }
  0x3c   :  { %p733_p11 = scmp.ne.s32.totalorder %s88_s22, %s732_s26  ;;  %p737_p12 = scmp.lt.s32.totalorder %s88_s22, %s88_s22 }
  0x3d   :  { %p738_p13 = scmp.lt.s32.totalorder %s736_s6, %s732_s26 }
  0x3f   :  { %p739_p0 = por %p738_p13, %p737_p12 }
  0x41   :  { %p740_p1 = pnand %p739_p0, %p733_p11 }
  0x43   :  { %743 = shalt.err (!%p740_p1)
}
  0x44   :  { %90 = dma.hbm_to_vmem [thread:$0]  %s1019_s10, 16, %s88_s22, [#allocation12]  }
  0x45   :  { %764 = dma.done.wait [#allocation3], 128  }
  0x46   :  { %765 = vsyncadd [#allocation3], 4294967168 }
  0x47   :  { %766 = dma.done.wait [#allocation6], 32  }
  0x48   :  { %767 = vsyncadd [#allocation6], 4294967264 }
  0x49   :  { %768 = dma.done.wait [#allocation9], 32  }
  0x4a   :  { %769 = vsyncadd [#allocation9], 4294967264 }
  0x4b   :  { %770 = dma.done.wait [#allocation12], 16  }
  0x4c   :  { %771 = vsyncadd [#allocation12], 4294967280  ;;  %v780_v0 = vmov 0.0   ;;  %vm781_vm0 = vmmov 0   ;;  %vm123_vm1 = vcmask 1041408   ;;  %v110_v2 = vld [vmem:[%s1010_s1] sm:$0xff] }
  0x4d   :  { %532 = vmatprep.subr.mxu0 %v780_v0  ;;  %536 = vmatprep.mubr.msk.f32.mxu0 %vm781_vm0, %v780_v0  ;;  %v111_v1 = vld [vmem:[%s1010_s1 + $0x8] sm:$0x3]  ;;  %v109_v3 = vld [vmem:[#allocation2] sm:$0xff]  ;;  %vm119_vm2 = vcmask 80896   ;;  %v253_v4 = vld [vmem:[%s1014_s5 + $0x78] sm:$0xff]  ;;  %vm466_vm5 = vcmask 121856  }
  0x4e   :  { %539 = vmatprep.subr.mxu1 %v780_v0  ;;  %571 = vmatprep.mubr.msk.f32.mxu1 %vm781_vm0, %v780_v0  ;;  %v252_v5 = vld [vmem:[%s1014_s5 + $0x70] sm:$0xff]  ;;  %v251_v6 = vld [vmem:[%s1014_s5 + $0x68] sm:$0xff]  ;;  %v250_v7 = vld [vmem:[%s1014_s5 + $0x60] sm:$0xff] }
  0x4f   :  { %533 = vmatpush3.msk.msra.mxu0 %vm123_vm1, %v111_v1  ;;  %540 = vmatpush3.msra.mxu1 %v253_v4  ;;  %v249_v8 = vld [vmem:[%s1014_s5 + $0x58] sm:$0xff]  ;;  %v248_v9 = vld [vmem:[%s1014_s5 + $0x50] sm:$0xff]  ;;  %v247_v10 = vld [vmem:[%s1014_s5 + $0x48] sm:$0xff] }
  0x50   :  { %534 = vmatprep.subr.mxu0 %v780_v0  ;;  %541 = vmatprep.subr.mxu1 %v780_v0  ;;  %v246_v11 = vld [vmem:[%s1014_s5 + $0x40] sm:$0xff]  ;;  %v245_v12 = vld [vmem:[%s1014_s5 + $0x38] sm:$0xff]  ;;  %v244_v13 = vld [vmem:[%s1014_s5 + $0x30] sm:$0xff] }
  0x51   :  { %535 = vmatpush3.msra.mxu0 %v110_v2  ;;  %542 = vmatpush3.msra.mxu1 %v252_v5  ;;  %v243_v14 = vld [vmem:[%s1014_s5 + $0x28] sm:$0xff]  ;;  %v242_v15 = vld [vmem:[%s1014_s5 + $0x20] sm:$0xff]  ;;  %v241_v16 = vld [vmem:[%s1014_s5 + $0x18] sm:$0xff] }
  0x52   :  { %537 = vmatmul.mubr.msk.f32.vlgmr.msra.gmra.mxu0 %vm119_vm2, %v109_v3  ;;  %574 = vmatprep.subr.mxu0 %v780_v0  ;;  %v240_v17 = vld [vmem:[%s1014_s5 + $0x10] sm:$0xff]  ;;  %v239_v18 = vld [vmem:[%s1014_s5 + $0x8] sm:$0xff]  ;;  %v238_v19 = vld [vmem:[%s1014_s5] sm:$0xff] }
  0x53   :  { %606 = vmatprep.mubr.msk.f32.mxu0 %vm781_vm0, %v780_v0  ;;  %543 = vmatprep.subr.mxu1 %v780_v0  ;;  %v486_v20 = vld [vmem:[%s1011_s2] ss:$0 sm:$0xff]  ;;  %v490_v47 = vld [vmem:[#allocation5] ss:$0 sm:$0xff]  ;;  %v387_v52 = vld [vmem:[%s1018_s9 + $0x78] sm:$0xff] }
  0x54   :  { %544 = vmatpush3.msra.mxu1 %v251_v6  ;;  %v489_v45 = vld [vmem:[%s1012_s3] ss:$0 sm:$0xff]  ;;  %575 = vmatpush3.msra.mxu0 %v387_v52  ;;  %v386_v53 = vld [vmem:[%s1018_s9 + $0x70] sm:$0xff]  ;;  %v385_v54 = vld [vmem:[%s1018_s9 + $0x68] sm:$0xff] }
  0x55   :  { %545 = vmatprep.subr.mxu1 %v780_v0  ;;  %576 = vmatprep.subr.mxu0 %v780_v0  ;;  %v384_v55 = vld [vmem:[%s1018_s9 + $0x60] sm:$0xff]  ;;  %v383_v56 = vld [vmem:[%s1018_s9 + $0x58] sm:$0xff]  ;;  %v382_v57 = vld [vmem:[%s1018_s9 + $0x50] sm:$0xff] }
  0x56   :  { %546 = vmatpush3.msra.mxu1 %v250_v7  ;;  %577 = vmatpush3.msra.mxu0 %v386_v53  ;;  %v381_v58 = vld [vmem:[%s1018_s9 + $0x48] sm:$0xff]  ;;  %v380_v59 = vld [vmem:[%s1018_s9 + $0x40] sm:$0xff]  ;;  %v379_v60 = vld [vmem:[%s1018_s9 + $0x38] sm:$0xff] }
  0x57   :  { %547 = vmatprep.subr.mxu1 %v780_v0  ;;  %578 = vmatprep.subr.mxu0 %v780_v0  ;;  %v378_v61 = vld [vmem:[%s1018_s9 + $0x30] sm:$0xff]  ;;  %v377_v62 = vld [vmem:[%s1018_s9 + $0x28] sm:$0xff]  ;;  %v376_v63 = vld [vmem:[%s1018_s9 + $0x20] sm:$0xff] }
  0x58   :  { %548 = vmatpush3.msra.mxu1 %v249_v8  ;;  %579 = vmatpush3.msra.mxu0 %v385_v54  ;;  %v375_v1 = vld [vmem:[%s1018_s9 + $0x18] sm:$0xff]  ;;  %v374_v2 = vld [vmem:[%s1018_s9 + $0x10] sm:$0xff]  ;;  %v373_v3 = vld [vmem:[%s1018_s9 + $0x8] sm:$0xff] }
  0x59   :  { %549 = vmatprep.subr.mxu1 %v780_v0  ;;  %580 = vmatprep.subr.mxu0 %v780_v0  ;;  %v372_v4 = vld [vmem:[%s1018_s9] sm:$0xff]  ;;  %v491_v5 = vld [vmem:[#allocation7] ss:$0 sm:$0xff]  ;;  %s782_s9 = smov [#allocation13]  }
  0x5a   :  { %550 = vmatpush3.msra.mxu1 %v248_v9  ;;  %581 = vmatpush3.msra.mxu0 %v384_v55  ;;  %s474_s20 = sshll.u32 %s782_s9, 4  ;;  %s475_s20 = int_to_ptr.vmem [resolvable:$true] %s474_s20 }
  0x5b   :  { %551 = vmatprep.subr.mxu1 %v780_v0  ;;  %582 = vmatprep.subr.mxu0 %v780_v0  ;;  %s744_s3 = scalar_lea.vmem %s475_s20, 128  ;;  %p749_p3 = scmp.lt.s32.totalorder %s475_s20, %s475_s20 }
  0x5c   :  { %552 = vmatpush3.msra.mxu1 %v247_v10  ;;  %583 = vmatpush3.msra.mxu0 %v383_v56  ;;  %p745_p2 = scmp.ne.s32.totalorder %s475_s20, %s744_s3  ;;  %p750_p4 = scmp.lt.s32.totalorder %s744_s3, %s744_s3 }
  0x5d   :  { %553 = vmatprep.subr.mxu1 %v780_v0  ;;  %584 = vmatprep.subr.mxu0 %v780_v0 }
  0x5e   :  { %554 = vmatpush3.msra.mxu1 %v246_v11  ;;  %585 = vmatpush3.msra.mxu0 %v382_v57  ;;  %p751_p5 = por %p750_p4, %p749_p3 }
  0x5f   :  { %555 = vmatprep.subr.mxu1 %v780_v0  ;;  %586 = vmatprep.subr.mxu0 %v780_v0 }
  0x60   :  { %556 = vmatpush3.msra.mxu1 %v245_v12  ;;  %587 = vmatpush3.msra.mxu0 %v381_v58  ;;  %p752_p6 = pnand %p751_p5, %p745_p2 }
  0x61   :  { %557 = vmatprep.subr.mxu1 %v780_v0  ;;  %588 = vmatprep.subr.mxu0 %v780_v0 }
  0x62   :  { %558 = vmatpush3.msra.mxu1 %v244_v13  ;;  %589 = vmatpush3.msra.mxu0 %v380_v59 }
  0x63   :  { %559 = vmatprep.subr.mxu1 %v780_v0  ;;  %590 = vmatprep.subr.mxu0 %v780_v0 }
  0x64   :  { %560 = vmatpush3.msra.mxu1 %v243_v14  ;;  %591 = vmatpush3.msra.mxu0 %v379_v60 }
  0x65   :  { %561 = vmatprep.subr.mxu1 %v780_v0  ;;  %592 = vmatprep.subr.mxu0 %v780_v0 }
  0x66   :  { %562 = vmatpush3.msra.mxu1 %v242_v15  ;;  %593 = vmatpush3.msra.mxu0 %v378_v61 }
  0x67   :  { %563 = vmatprep.subr.mxu1 %v780_v0  ;;  %594 = vmatprep.subr.mxu0 %v780_v0 }
  0x68   :  { %564 = vmatpush3.msra.mxu1 %v241_v16  ;;  %595 = vmatpush3.msra.mxu0 %v377_v62 }
  0x69   :  { %565 = vmatprep.subr.mxu1 %v780_v0  ;;  %596 = vmatprep.subr.mxu0 %v780_v0 }
  0x6a   :  { %566 = vmatpush3.msra.mxu1 %v240_v17  ;;  %597 = vmatpush3.msra.mxu0 %v376_v63 }
  0x6b   :  { %567 = vmatprep.subr.mxu1 %v780_v0  ;;  %598 = vmatprep.subr.mxu0 %v780_v0 }
  0x6c   :  { %568 = vmatpush3.msra.mxu1 %v239_v18  ;;  %599 = vmatpush3.msra.mxu0 %v375_v1 }
  0x6d   :  { %569 = vmatprep.subr.mxu1 %v780_v0  ;;  %600 = vmatprep.subr.mxu0 %v780_v0 }
  0x6e   :  { %570 = vmatpush3.msra.mxu1 %v238_v19  ;;  %601 = vmatpush3.msra.mxu0 %v374_v2 }
  0x6f   :  { %602 = vmatprep.subr.mxu0 %v780_v0 }
  0x70   :  { %603 = vmatpush3.msra.mxu0 %v373_v3 }
  0x71   :  { %604 = vmatprep.subr.mxu0 %v780_v0 }
  0x72   :  { %605 = vmatpush3.msra.mxu0 %v372_v4 }
 0x112   :  { %v193_v21 = vpop.f32.mrf.mxu0 }
 0x113   :  { %v194_v22 = vadd.f32 %v486_v20, %v193_v21 }
 0x114   :  { %v538_v23 = vpop.f32.mrf.mxu0 }
 0x115   :  { %v199_v24 = vrot.slane %v194_v22, 4  ;;  %v205_v25 = vmul.f32 %v194_v22, %v194_v22 }
 0x117   :  { %v200_v26 = vadd.f32 %v199_v24, %v194_v22  ;;  %v206_v27 = vrot.slane %v205_v25, 4 }
 0x119   :  { %v201_v28 = vrot.slane %v200_v26, 2  ;;  %v207_v29 = vadd.f32 %v206_v27, %v205_v25 }
 0x11b   :  { %v202_v30 = vadd.f32 %v201_v28, %v200_v26  ;;  %v208_v31 = vrot.slane %v207_v29, 2 }
 0x11d   :  { %v203_v32 = vrot.slane %v202_v30, 1  ;;  %v209_v33 = vadd.f32 %v208_v31, %v207_v29  ;;  %v492_v29 = vld [vmem:[#allocation8] ss:$0 sm:$0xff]  ;;  %v493_v31 = vld [vmem:[#allocation10] ss:$0 sm:$0xff] }
 0x11f   :  { %v204_v34 = vadd.f32 %v203_v32, %v202_v30  ;;  %v210_v35 = vrot.slane %v209_v33, 1 }
 0x121   :  { %v211_v36 = vadd.f32 %v210_v35, %v209_v33  ;;  %v212_v37 = vmul.f32 0.125, %v204_v34 }
 0x123   :  { %v213_v38 = vmul.f32 0.125, %v211_v36  ;;  %v214_v39 = vmul.f32 %v212_v37, %v212_v37  ;;  %v217_v43 = vsub.f32 %v194_v22, %v212_v37  ;;  %v494_v36 = vld [vmem:[#allocation11] ss:$0 sm:$0xff] }
 0x125   :  { %v215_v40 = vsub.f32 %v213_v38, %v214_v39 }
 0x127   :  { %v216_v41 = vmax.f32 %v215_v40, 0.0 }
 0x129   :  { %v218_v42 = vadd.f32 1e-05, %v216_v41 }
 0x12b   :  { %618 = vrsqrt.f32 %v218_v42 }
 0x138   :  { %v619_v44 = vpop.eup %618 }
 0x139   :  { %v220_v46 = vmul.f32 %v619_v44, %v217_v43 }
 0x13b   :  { %v227_v48 = vmul.f32 %v489_v45, %v220_v46 }
 0x13d   :  { %v234_v49 = vadd.f32 %v490_v47, %v227_v48 }
 0x13f   :  { %vm235_vm3 = vcmp.ge.f32.partialorder %v234_v49, 0.0  ;;  %v236_v50 = vmul.f32 0.2, %v234_v49 }
 0x141   :  { %v237_v51 = vsel %vm235_vm3, %v234_v49, %v236_v50 }
 0x142   :  { %572 = vmatmul.mubr.f32.vlgmr.msra.gmra.mxu1 %v237_v51 }
 0x202   :  { %v327_v6 = vpop.f32.mrf.mxu1 }
 0x203   :  { %v328_v7 = vadd.f32 %v491_v5, %v327_v6 }
 0x204   :  { %v573_v8 = vpop.f32.mrf.mxu1 }
 0x205   :  { %v333_v9 = vrot.slane %v328_v7, 4  ;;  %v339_v10 = vmul.f32 %v328_v7, %v328_v7 }
 0x207   :  { %v334_v11 = vadd.f32 %v333_v9, %v328_v7  ;;  %v340_v12 = vrot.slane %v339_v10, 4 }
 0x209   :  { %v335_v13 = vrot.slane %v334_v11, 2  ;;  %v341_v14 = vadd.f32 %v340_v12, %v339_v10 }
 0x20b   :  { %v336_v15 = vadd.f32 %v335_v13, %v334_v11  ;;  %v342_v16 = vrot.slane %v341_v14, 2 }
 0x20d   :  { %v337_v17 = vrot.slane %v336_v15, 1  ;;  %v343_v18 = vadd.f32 %v342_v16, %v341_v14 }
 0x20f   :  { %v338_v19 = vadd.f32 %v337_v17, %v336_v15  ;;  %v344_v20 = vrot.slane %v343_v18, 1 }
 0x211   :  { %v345_v21 = vadd.f32 %v344_v20, %v343_v18  ;;  %v346_v22 = vmul.f32 0.125, %v338_v19 }
 0x213   :  { %v347_v0 = vmul.f32 0.125, %v345_v21  ;;  %v348_v23 = vmul.f32 %v346_v22, %v346_v22  ;;  %v351_v27 = vsub.f32 %v328_v7, %v346_v22 }
 0x215   :  { %v349_v24 = vsub.f32 %v347_v0, %v348_v23 }
 0x217   :  { %v350_v25 = vmax.f32 %v349_v24, 0.0 }
 0x219   :  { %v352_v26 = vadd.f32 1e-05, %v350_v25 }
 0x21b   :  { %620 = vrsqrt.f32 %v352_v26 }
 0x228   :  { %v621_v28 = vpop.eup %620 }
 0x229   :  { %v354_v30 = vmul.f32 %v621_v28, %v351_v27 }
 0x22b   :  { %v361_v32 = vmul.f32 %v492_v29, %v354_v30 }
 0x22d   :  { %v368_v33 = vadd.f32 %v493_v31, %v361_v32 }
 0x22f   :  { %vm369_vm4 = vcmp.ge.f32.partialorder %v368_v33, 0.0  ;;  %v370_v34 = vmul.f32 0.2, %v368_v33 }
 0x231   :  { %v371_v35 = vsel %vm369_vm4, %v368_v33, %v370_v34 }
 0x232   :  { %607 = vmatmul.mubr.f32.vlgmr.msra.gmra.mxu0 %v371_v35 }
 0x2f2   :  { %v461_v37 = vpop.f32.mrf.mxu0 }
 0x2f3   :  { %v462_v38 = vadd.f32 %v494_v36, %v461_v37 }
 0x2f4   :  { %v608_v39 = vpop.f32.mrf.mxu0 }
 0x2f5   :  { %622 = vtanh.f32 %v462_v38 }
 0x302   :  { %v623_v40 = vpop.eup %622 }
 0x303   :  { %467 = vst.msk [vmem:[#allocation13] sm:$0xff] %vm466_vm5, %v623_v40 }
 0x304   :  { %755 = shalt.err (!%p752_p6)
}
 0x305   :  { %477 = dma.vmem_to_hbm [thread:$0]  %s475_s20, 128, %s1020_s11, [#allocation4]  }
 0x306   :  { %772 = dma.done.wait [#allocation4], 128  }
 0x307   :  { %773 = vsyncadd [#allocation4], 4294967168 }
 0x308   :  { %481 = vsyncpa [#allocation3], 1 }
 0x309   :  { %482 = vsyncpa [#allocation6], 1 }
 0x30a   :  { %483 = vsyncpa [#allocation9], 1 }
 0x30b   :  { %484 = vsyncpa [#allocation12], 1 }
 0x30c   :  { %485 = vsyncpa [#allocation4], 1 }

</bundles_post_ra>
